<compile_context>
chip_gen: v7x
topology: tpu7x:2x2x1
jax: 0.10.0
libtpu: 0.0.40
codegen_flags: <defaults>
</compile_context>

<pallas_src>
import functools

import jax
import jax.numpy as jnp
from jax.experimental import pallas as pl
from jax.experimental.pallas import tpu as pltpu


def _round_up(n, m):
    return ((n + m - 1) // m) * m


def _disc_sas_kernel(x_ref, wbd_ref, b1_ref, w2_ref, b2_ref, w3_ref, b3_ref,
                     o_ref):
    # (1) Fused trunks: one block-diagonal matmul replaces the three
    #     per-trunk matmuls + the lane-axis concat.  The (optional) bf16
    #     cast of x happens HERE, so x only crosses HBM once, as f32.
    #     MXU accumulates in f32.  (For bit-exact f32 one could additionally
    #     pass precision=HIGHEST; kernel is HBM-bound so it would be free.)
    x = x_ref[...].astype(wbd_ref.dtype)
    h = jnp.tanh(
        jnp.dot(x, wbd_ref[...], preferred_element_type=jnp.float32)
        + b1_ref[...])

    # (2) trunk[0]: Linear + Tanh.  tanh stays f32 on every chip (v5e EUP has
    #     no bf16); activations are re-cast only for the MXU operand.
    h2 = jnp.tanh(
        jnp.dot(h.astype(w2_ref.dtype), w2_ref[...],
                preferred_element_type=jnp.float32)
        + b2_ref[...])

    # (3) trunk[2]: [hidden, 1] Linear done as VPU multiply + XLU lane-reduce
    #     (an N=1 MXU matmul wastes 127/128 lanes), then transposed into a
    #     LANE-DENSE [1, 1, tb] row so the store is an unmasked vst and the
    #     output tile is not lane-padded 128x in VMEM.
    #     NOTE: for toy hidden sizes (3*h2 < 128) the tanh'd vregs above are
    #     mostly lane padding; this disappears at production hidden_dim.
    col = jnp.sum(h2 * w3_ref[...], axis=1, keepdims=True)      # [tb, 1]
    o_ref[...] = (col.T + b3_ref[...])[None]                    # [1, 1, tb]


def prepare_params(params, *, state_dim, action_dim, use_bf16=False):
    """Fold the three trunk Linears into one block-diagonal weight + fused
    bias.  Call ONCE per parameter set (outside the forward loop); the jitted
    forward then consumes the fused tuple directly (no per-call scatter)."""
    (ws, bs, wa, ba, wn, bn, w2, b2, w3, b3) = params
    assert action_dim > 0, "state-only (action_dim==0) branch not implemented"
    h2dim = wa.shape[1]                    # hidden_dim // 2
    hidden = w2.shape[1]
    feat = 2 * state_dim + action_dim

    wbd = jnp.zeros((feat, 3 * h2dim), jnp.float32)
    wbd = wbd.at[:state_dim, :h2dim].set(ws)
    wbd = wbd.at[state_dim:state_dim + action_dim, h2dim:2 * h2dim].set(wa)
    wbd = wbd.at[state_dim + action_dim:, 2 * h2dim:].set(wn)
    b1 = jnp.concatenate([bs, ba, bn], axis=1)            # [1, 3*h2dim]
    w3_row = w3.reshape(1, hidden)                         # [1, hidden]

    # Only the MXU weight operands get the optional bf16 cast; biases, w3 and
    # tanh stay f32.  On v5e keep use_bf16=False (kernel is HBM-bound there).
    wdtype = jnp.bfloat16 if use_bf16 else jnp.float32
    return (wbd.astype(wdtype), b1, w2.astype(wdtype), b2, w3_row, b3)


@functools.partial(jax.jit, static_argnames=("block_b",))
def discriminator_sas_forward(x, fused_params, *, block_b=4096):
    """x: [B, 2*state_dim + action_dim] float32.  Returns [B, 1] float32."""
    wbd, b1, w2, b2, w3_row, b3 = fused_params
    B, feat = x.shape
    assert feat == wbd.shape[0], "only the SAS concat branch is implemented"
    h1 = wbd.shape[1]
    hidden = w2.shape[1]

    # --- Batch row tile.  No input padding: the grid is cdiv(B, tb); the
    #     ragged last tile's OOB rows produce garbage that only lands in
    #     output lanes >= B, which the wrapper slices away.
    block_b = max(8, _round_up(block_b, 8))
    tb = B if B <= block_b else block_b          # full-dim block when it fits
    if pl.cdiv(B, tb) < 2 and B >= 2048:
        # v7x has 2 TensorCores: keep >= 2 "parallel" grid steps when the
        # batch is large enough to split (harmless on single-TC v5e/v6e).
        tb = _round_up(pl.cdiv(B, 2), 8)
    num_blocks = pl.cdiv(B, tb)

    # --- Explicit VMEM budget so a large tb also fits v7x's 64 MiB.
    lp = lambda n: _round_up(max(int(n), 1), 128)     # lane pad
    sp = lambda n: _round_up(max(int(n), 1), 8)       # sublane pad
    w_bytes = sum(int(a.size) * a.dtype.itemsize
                  for a in (wbd, b1, w2, b2, w3_row, b3))
    est = (2 * sp(tb) * lp(feat) * 4                  # double-buffered x tiles (f32)
           + 2 * 8 * lp(tb) * 4                       # double-buffered lane-dense out rows
           + 8 * w_bytes                              # resident weights (pad + 2 buffers)
           + sp(tb) * (lp(feat) + lp(h1) + 2 * lp(hidden)) * 4)   # live activations
    vmem_limit = int(min(64 << 20, max(32 << 20, 2 * est)))

    const = lambda i: (0, 0)        # weights / biases stay resident in VMEM
    # NOTE: for production hidden sizes on v7x, pipeline_mode=pl.Buffered(1)
    # on these constant-index specs would halve resident-weight VMEM.
    out = pl.pallas_call(
        _disc_sas_kernel,
        out_shape=jax.ShapeDtypeStruct((num_blocks, 1, tb), jnp.float32),
        grid=(num_blocks,),
        in_specs=[
            pl.BlockSpec((tb, feat), lambda i: (i, 0)),      # x row tile
            pl.BlockSpec(wbd.shape, const),                  # block-diag W1
            pl.BlockSpec(b1.shape, const),                   # fused bias 1
            pl.BlockSpec(w2.shape, const),                   # trunk W2
            pl.BlockSpec(b2.shape, const),                   # bias 2
            pl.BlockSpec(w3_row.shape, const),               # W3 as a row
            pl.BlockSpec(b3.shape, const),                   # bias 3
        ],
        out_specs=pl.BlockSpec((1, 1, tb), lambda i: (i, 0, 0)),  # lane-dense
        compiler_params=pltpu.CompilerParams(
            dimension_semantics=("parallel",),
            vmem_limit_bytes=vmem_limit),
    )(x, wbd, b1, w2, b2, w3_row, b3)
    return out.reshape(-1)[:B].reshape(B, 1)


def init_params(key, state_dim, action_dim, hidden_dim):
    """Deterministic init mimicking PyTorch nn.Linear default (U[-1/sqrt(fan_in), +])."""
    h2 = hidden_dim // 2
    state_hidden = hidden_dim if action_dim == 0 else h2
    act_in = 1 if action_dim == 0 else action_dim

    def linear(k, fan_in, fan_out):
        kw, kb = jax.random.split(k)
        bound = 1.0 / jnp.sqrt(jnp.float32(fan_in))
        # weight stored as [in, out] so the kernel computes x @ W + b
        w = jax.random.uniform(kw, (fan_in, fan_out), jnp.float32, -bound, bound)
        b = jax.random.uniform(kb, (1, fan_out), jnp.float32, -bound, bound)
        return w, b

    keys = jax.random.split(key, 5)
    ws, bs = linear(keys[0], state_dim, state_hidden)     # state_trunk
    wa, ba = linear(keys[1], act_in, h2)                  # action_trunk
    wn, bn = linear(keys[2], state_dim, state_hidden)     # next_state_trunk
    w2, b2 = linear(keys[3], 3 * h2, hidden_dim)          # trunk[0]
    w3, b3 = linear(keys[4], hidden_dim, 1)               # trunk[2]
    return (ws, bs, wa, ba, wn, bn, w2, b2, w3, b3)


def reference_forward(x, params, state_dim, action_dim):
    """Pure-JAX reference (un-fused, matches the PyTorch forward)."""
    (ws, bs, wa, ba, wn, bn, w2, b2, w3, b3) = params
    s = x[:, :state_dim]
    a = x[:, state_dim:state_dim + action_dim]
    ns = x[:, state_dim + action_dim:]
    h = jnp.concatenate([
        jnp.tanh(s @ ws + bs),
        jnp.tanh(a @ wa + ba),
        jnp.tanh(ns @ wn + bn),
    ], axis=1)
    return jnp.tanh(h @ w2 + b2) @ w3 + b3


if __name__ == "__main__":
    # Small, forward-consistent shapes: input = [state | action | next_state].
    state_dim, action_dim, hidden_dim = 12, 4, 32
    batch = 10          # deliberately not a multiple of 8: exact-dim tile path

    key = jax.random.PRNGKey(0)
    k_param, k_x = jax.random.split(key)
    params = init_params(k_param, state_dim, action_dim, hidden_dim)
    x = jax.random.normal(k_x, (batch, 2 * state_dim + action_dim), jnp.float32)

    ref = reference_forward(x, params, state_dim, action_dim)

    # f32 compute path (default; correct on v5e/v6e/v7x)
    fused = prepare_params(params, state_dim=state_dim, action_dim=action_dim)
    out = jax.block_until_ready(discriminator_sas_forward(x, fused))
    assert out.shape == (batch, 1)
    assert jnp.allclose(out, ref, atol=1e-5, rtol=1e-5), (out, ref)

    # Multi-block path with a ragged final tile (no input padding anywhere).
    big_batch = 300
    xb = jax.random.normal(jax.random.PRNGKey(1),
                           (big_batch, 2 * state_dim + action_dim), jnp.float32)
    refb = reference_forward(xb, params, state_dim, action_dim)
    outb = jax.block_until_ready(
        discriminator_sas_forward(xb, fused, block_b=128))
    assert outb.shape == (big_batch, 1)
    assert jnp.allclose(outb, refb, atol=1e-5, rtol=1e-5), (outb, refb)

    # bf16 weight path (MXU-native on v6e/v7x); x is cast in-kernel, tanh and
    # accumulation stay f32; looser tolerance.  Skip on v5e in production.
    fused_bf16 = prepare_params(params, state_dim=state_dim,
                                action_dim=action_dim, use_bf16=True)
    out_bf16 = jax.block_until_ready(discriminator_sas_forward(x, fused_bf16))
    assert out_bf16.shape == (batch, 1)
    assert jnp.allclose(out_bf16, ref, atol=1e-1, rtol=1e-1), (out_bf16, ref)

    print("KERNEL_OK")
</pallas_src>

<mosaic_0001>
module attributes {stable_mosaic.version = 11 : i64} {
  func.func @_disc_sas_kernel(%arg0: i32, %arg1: memref<10x28xf32, #tpu.memory_space<vmem>>, %arg2: memref<28x48xf32, #tpu.memory_space<vmem>>, %arg3: memref<1x48xf32, #tpu.memory_space<vmem>>, %arg4: memref<48x32xf32, #tpu.memory_space<vmem>>, %arg5: memref<1x32xf32, #tpu.memory_space<vmem>>, %arg6: memref<1x32xf32, #tpu.memory_space<vmem>>, %arg7: memref<1x1xf32, #tpu.memory_space<vmem>>, %arg8: memref<1x1x10xf32, #tpu.memory_space<vmem>>) attributes {dimension_semantics = [#tpu.dimension_semantics<parallel>], iteration_bounds = array<i64: 1>, scalar_prefetch = 0 : i64, scratch_operands = 0 : i64, tpu.core_type = #tpu.core_type<tc>, window_params = [{transform_indices = @transform_0, window_bounds = array<i64: 10, 28>}, {pipeline_mode = #tpu.pipeline_mode<synchronous>, transform_indices = @transform_1, window_bounds = array<i64: 28, 48>}, {pipeline_mode = #tpu.pipeline_mode<synchronous>, transform_indices = @transform_2, window_bounds = array<i64: 1, 48>}, {pipeline_mode = #tpu.pipeline_mode<synchronous>, transform_indices = @transform_3, window_bounds = array<i64: 48, 32>}, {pipeline_mode = #tpu.pipeline_mode<synchronous>, transform_indices = @transform_4, window_bounds = array<i64: 1, 32>}, {pipeline_mode = #tpu.pipeline_mode<synchronous>, transform_indices = @transform_5, window_bounds = array<i64: 1, 32>}, {pipeline_mode = #tpu.pipeline_mode<synchronous>, transform_indices = @transform_6, window_bounds = array<i64: 1, 1>}, {transform_indices = @transform_7, window_bounds = array<i64: 1, 1, 10>}]} {
    %c0 = arith.constant 0 : index
    %c0_0 = arith.constant 0 : index
    %0 = vector.load %arg1[%c0, %c0_0] : memref<10x28xf32, #tpu.memory_space<vmem>>, vector<10x28xf32>
    %c0_1 = arith.constant 0 : index
    %c0_2 = arith.constant 0 : index
    %1 = vector.load %arg2[%c0_1, %c0_2] : memref<28x48xf32, #tpu.memory_space<vmem>>, vector<28x48xf32>
    %cst = arith.constant dense<0.000000e+00> : vector<10x48xf32>
    %2 = tpu.matmul %0, %1, %cst {dimension_numbers = #tpu.dot_dimension_numbers<[1], [0], [0], [1], [0, 0, 1, 1], [], []>} : vector<10x28xf32>, vector<28x48xf32>, vector<10x48xf32> -> vector<10x48xf32>
    %c0_3 = arith.constant 0 : index
    %c0_4 = arith.constant 0 : index
    %3 = vector.load %arg3[%c0_3, %c0_4] : memref<1x48xf32, #tpu.memory_space<vmem>>, vector<1x48xf32>
    %4 = vector.broadcast %3 : vector<1x48xf32> to vector<10x48xf32>
    %5 = arith.addf %2, %4 : vector<10x48xf32>
    %6 = math.tanh %5 : vector<10x48xf32>
    %c0_5 = arith.constant 0 : index
    %c0_6 = arith.constant 0 : index
    %7 = vector.load %arg4[%c0_5, %c0_6] : memref<48x32xf32, #tpu.memory_space<vmem>>, vector<48x32xf32>
    %cst_7 = arith.constant dense<0.000000e+00> : vector<10x32xf32>
    %8 = tpu.matmul %6, %7, %cst_7 {dimension_numbers = #tpu.dot_dimension_numbers<[1], [0], [0], [1], [0, 0, 1, 1], [], []>} : vector<10x48xf32>, vector<48x32xf32>, vector<10x32xf32> -> vector<10x32xf32>
    %c0_8 = arith.constant 0 : index
    %c0_9 = arith.constant 0 : index
    %9 = vector.load %arg5[%c0_8, %c0_9] : memref<1x32xf32, #tpu.memory_space<vmem>>, vector<1x32xf32>
    %10 = vector.broadcast %9 : vector<1x32xf32> to vector<10x32xf32>
    %11 = arith.addf %8, %10 : vector<10x32xf32>
    %12 = math.tanh %11 : vector<10x32xf32>
    %c0_10 = arith.constant 0 : index
    %c0_11 = arith.constant 0 : index
    %13 = vector.load %arg6[%c0_10, %c0_11] : memref<1x32xf32, #tpu.memory_space<vmem>>, vector<1x32xf32>
    %14 = vector.broadcast %13 : vector<1x32xf32> to vector<10x32xf32>
    %15 = arith.mulf %12, %14 : vector<10x32xf32>
    %cst_12 = arith.constant dense<0.000000e+00> : vector<10xf32>
    %16 = vector.multi_reduction <add>, %15, %cst_12 [1] : vector<10x32xf32> to vector<10xf32>
    %17 = vector.shape_cast %16 : vector<10xf32> to vector<10x1xf32>
    %18 = tpu.transpose %17, [1, 0] : vector<10x1xf32> -> vector<1x10xf32>
    %c0_13 = arith.constant 0 : index
    %c0_14 = arith.constant 0 : index
    %19 = vector.load %arg7[%c0_13, %c0_14] : memref<1x1xf32, #tpu.memory_space<vmem>>, vector<1x1xf32>
    %20 = vector.broadcast %19 : vector<1x1xf32> to vector<1x10xf32>
    %21 = arith.addf %18, %20 : vector<1x10xf32>
    %22 = vector.shape_cast %21 : vector<1x10xf32> to vector<1x1x10xf32>
    %c0_15 = arith.constant 0 : index
    %c0_16 = arith.constant 0 : index
    %c0_17 = arith.constant 0 : index
    %23 = vector.load %arg8[%c0_15, %c0_16, %c0_17] : memref<1x1x10xf32, #tpu.memory_space<vmem>>, vector<1x1x10xf32>
    tpu.vector_store %arg8[%c0_15, %c0_16, %c0_17], %22 {strides = array<i32>} : memref<1x1x10xf32, #tpu.memory_space<vmem>>, vector<1x1x10xf32>,
    return
  }
  func.func @transform_0(%arg0: i32) -> (i32, i32) {
    %c0_i32 = arith.constant 0 : i32
    %c0_i32_0 = arith.constant 0 : i32
    return %arg0, %c0_i32 : i32, i32
  }
  func.func @transform_1(%arg0: i32) -> (i32, i32) {
    %c0_i32 = arith.constant 0 : i32
    %c0_i32_0 = arith.constant 0 : i32
    %c0_i32_1 = arith.constant 0 : i32
    return %c0_i32, %c0_i32_0 : i32, i32
  }
  func.func @transform_2(%arg0: i32) -> (i32, i32) {
    %c0_i32 = arith.constant 0 : i32
    %c0_i32_0 = arith.constant 0 : i32
    %c0_i32_1 = arith.constant 0 : i32
    return %c0_i32, %c0_i32_0 : i32, i32
  }
  func.func @transform_3(%arg0: i32) -> (i32, i32) {
    %c0_i32 = arith.constant 0 : i32
    %c0_i32_0 = arith.constant 0 : i32
    %c0_i32_1 = arith.constant 0 : i32
    return %c0_i32, %c0_i32_0 : i32, i32
  }
  func.func @transform_4(%arg0: i32) -> (i32, i32) {
    %c0_i32 = arith.constant 0 : i32
    %c0_i32_0 = arith.constant 0 : i32
    %c0_i32_1 = arith.constant 0 : i32
    return %c0_i32, %c0_i32_0 : i32, i32
  }
  func.func @transform_5(%arg0: i32) -> (i32, i32) {
    %c0_i32 = arith.constant 0 : i32
    %c0_i32_0 = arith.constant 0 : i32
    %c0_i32_1 = arith.constant 0 : i32
    return %c0_i32, %c0_i32_0 : i32, i32
  }
  func.func @transform_6(%arg0: i32) -> (i32, i32) {
    %c0_i32 = arith.constant 0 : i32
    %c0_i32_0 = arith.constant 0 : i32
    %c0_i32_1 = arith.constant 0 : i32
    return %c0_i32, %c0_i32_0 : i32, i32
  }
  func.func @transform_7(%arg0: i32) -> (i32, i32, i32) {
    %c0_i32 = arith.constant 0 : i32
    %c0_i32_0 = arith.constant 0 : i32
    %c0_i32_1 = arith.constant 0 : i32
    return %arg0, %c0_i32, %c0_i32_0 : i32, i32, i32
  }
}

</mosaic_0001>

<bundles_post_ra>
// kernel: discriminator_sas_forward.1
= control target key start
LH: loop header
LB: loop body
LE: loop exit
PB: predicated region body
PF: predicated region fallthrough
CT: control target
= control target key end

     0   :  { %s514_s0 = inlined_call_operand.vmem [shape: f32[10,28], index: 0, kind: input, shape index: {}]   ;;  %s515_s1 = inlined_call_operand.vmem [shape: f32[28,48], index: 1, kind: input, shape index: {}]   ;;  %s516_s2 = inlined_call_operand.vmem [shape: f32[1,48], index: 2, kind: input, shape index: {}]   ;;  %s517_s3 = inlined_call_operand.vmem [shape: f32[48,32], index: 3, kind: input, shape index: {}]   ;;  %s518_s4 = inlined_call_operand.vmem [shape: f32[1,32], index: 4, kind: input, shape index: {}]   ;;  %s519_s5 = inlined_call_operand.vmem [shape: f32[1,32], index: 5, kind: input, shape index: {}]   ;;  %s520_s6 = inlined_call_operand.<no memory space> [shape: f32[1,1], index: 6, kind: input, shape index: {}]   ;;  %s521_s7 = inlined_call_operand.hbm [shape: f32[1,1,10], index: 7, kind: output, shape index: {}]  }
   0x1   :  { %v12_v0 = vstv %s520_s6 }
   0x2   :  { %13 = vst [vmem:[#allocation2] sm:$0x1] %v12_v0 }
   0x3   :  { %v31_v1 = vld [vmem:[%s515_s1] sm:$0xff]  ;;  %v32_v2 = vld [vmem:[%s515_s1 + $0x8] sm:$0xff]  ;;  %v33_v3 = vld [vmem:[%s515_s1 + $0x10] sm:$0xff]  ;;  %vm49_vm0 = vcmask 1043456   ;;  %vm42_vm1 = vcmask 228352   ;;  %vm411_vm2 = vmmov 1  }
   0x4   :  { %v351_v4 = vpack.c.bf16 %v32_v2, %v31_v1  ;;  %v34_v5 = vld [vmem:[%s515_s1 + $0x18] sm:$0xf]  ;;  %vm356_vm3 = vmpackc.low %vm49_vm0, %vm411_vm2  ;;  %v29_v6 = vld [vmem:[%s514_s0] sm:$0xff] }
   0x5   :  { %v355_v7 = vpack.c.bf16 %v34_v5, %v33_v3  ;;  %333 = vmatprep.mubr.msk.f32.mxu0 %vm42_vm1, %v29_v6 }
   0x6   :  { %14 = vsyncpa [#allocation4], 0  ;;  %352 = vmatprep.subr.bf16.mxu0 %v351_v4  ;;  %v30_v8 = vld [vmem:[%s514_s0 + $0x8] sm:$0x3]  ;;  %v130_v9 = vld [vmem:[%s517_s3] sm:$0xff]  ;;  %vm143_vm4 = vcmask 392192   ;;  %v282_v41 = vlaneseq }
   0x7   :  { %354 = vmatpush3.bf16.msra.mxu0 %v351_v4  ;;  %v131_v10 = vld [vmem:[%s517_s3 + $0x8] sm:$0xff]  ;;  %v132_v12 = vld [vmem:[%s517_s3 + $0x10] sm:$0xff]  ;;  %v133_v13 = vld [vmem:[%s517_s3 + $0x18] sm:$0xff]  ;;  %v412_v26 = vmov 0   ;;  %vm236_vm5 = vcmask 261120   ;;  %vm240_vm6 = vcmask 254976  }
   0x8   :  { %357 = vmatprep.subr.msk.bf16.mxu0 %vm356_vm3, %v355_v7  ;;  %v361_v11 = vpack.c.bf16 %v131_v10, %v130_v9  ;;  %v134_v14 = vld [vmem:[%s517_s3 + $0x20] sm:$0xff]  ;;  %v365_v15 = vpack.c.bf16 %v133_v13, %v132_v12  ;;  %v135_v16 = vld [vmem:[%s517_s3 + $0x28] sm:$0xff]  ;;  %377 = vset.pattern.permute.xlu1 %v412_v26  ;;  %v283_v42 = vshrl.u32 %v282_v41, 7  ;;  %vm287_vm7 = vcmask 73728  }
   0x9   :  { %v369_v17 = vpack.c.bf16 %v135_v16, %v134_v14  ;;  %v303_v18 = vld [vmem:[%s516_s2] ss:$0 sm:$0xff]  ;;  %378 = vset.pattern.permute.xlu0 %v412_v26 }
   0xa   :  { %362 = vmatprep.subr.bf16.mxu1 %v361_v11  ;;  %v276_v25 = vld [vmem:[#allocation2] sm:$0x1]  ;;  %v284_v43 = vsub.s32 0, %v283_v42 }
   0xb   :  { %360 = vmatpush3.bf16.msk.msra.mxu0 %vm356_vm3, %v355_v7  ;;  %364 = vmatpush3.bf16.msra.mxu1 %v361_v11  ;;  %v307_v27 = vld [vmem:[%s518_s4] ss:$0 sm:$0xff]  ;;  %s413_s4 = smov [#allocation3]  }
   0xc   :  { %366 = vmatprep.subr.bf16.mxu1 %v365_v15  ;;  %279 = vperm.xlu1 %377, %v276_v25   ;;  %v310_v32 = vld [vmem:[%s519_s5] ss:$0 sm:$0xff]  ;;  %s295_s5 = sshll.u32 %s413_s4, 4  ;;  %s296_s5 = int_to_ptr.vmem [resolvable:$true] %s295_s5 }
   0xd   :  { %s387_s28 = scalar_lea.vmem %s296_s5, 16  ;;  %s391_s29 = scalar_lea.vmem %s296_s5, 32 }
   0xe   :  { %334 = vmatmul.mubr.msk.f32.vlgmr.msra.gmra.mrb[0].mxu0 %vm42_vm1, %v30_v8  ;;  %p388_p0 = scmp.ne.s32.totalorder %s296_s5, %s387_s28  ;;  %p392_p1 = scmp.lt.s32.totalorder %s296_s5, %s296_s5 }
   0xf   :  { %368 = vmatpush3.bf16.msra.mxu1 %v365_v15  ;;  %p393_p2 = scmp.lt.s32.totalorder %s391_s29, %s387_s28 }
  0x10   :  { %370 = vmatprep.subr.bf16.mxu1 %v369_v17 }
  0x11   :  { %p394_p3 = por %p393_p2, %p392_p1 }
  0x13   :  { %372 = vmatpush3.bf16.msra.mxu1 %v369_v17  ;;  %p395_p4 = pnand %p394_p3, %p388_p0 }
  0x8b   :  { %v280_v44 = vpop.permute.xlu1 %279 }
  0x8c   :  { %v285_v45 = vrot.slane %v280_v44, %v284_v43 }
  0xe1   :  { %v335_v19 = vpop.f32.mrb[0].mxu0 }
  0xe2   :  { %v125_v20 = vadd.f32 %v335_v19, %v303_v18  ;;  %v119_v21 = vpop.f32.mrb[1].mxu0 }
  0xe3   :  { %v120_v22 = vadd.f32 %v303_v18, %v119_v21 }
  0xe5   :  { %379 = vtanh.f32 %v120_v22 }
  0xe6   :  { %381 = vtanh.f32 %v125_v20 }
  0xef   :  { %v380_v23 = vpop.eup %379 }
  0xf0   :  { %v382_v24 = vpop.eup %381  ;;  %348 = vmatprep.mubr.msk.f32.mxu1 %vm143_vm4, %v380_v23 }
  0xf1   :  { %349 = vmatmul.mubr.msk.f32.vlgmr.msra.gmra.mrb[0].mxu1 %vm143_vm4, %v382_v24 }
 0x1c4   :  { %v350_v28 = vpop.f32.mrb[0].mxu1 }
 0x1c5   :  { %v222_v29 = vadd.f32 %v350_v28, %v307_v27  ;;  %v216_v30 = vpop.f32.mrb[1].mxu1 }
 0x1c6   :  { %v217_v31 = vadd.f32 %v307_v27, %v216_v30 }
 0x1c7   :  { %383 = vtanh.f32 %v222_v29 }
 0x1c8   :  { %385 = vtanh.f32 %v217_v31 }
 0x1d1   :  { %v384_v33 = vpop.eup %383 }
 0x1d2   :  { %v386_v34 = vpop.eup %385  ;;  %v235_v37 = vmul.f32 %v384_v33, %v310_v32 }
 0x1d3   :  { %v234_v35 = vmul.f32 %v386_v34, %v310_v32 }
 0x1d4   :  { %v241_v38 = vsel %vm240_vm6, %v235_v37, 0.0 }
 0x1d5   :  { %v237_v36 = vsel %vm236_vm5, %v234_v35, 0.0 }
 0x1d6   :  { %238 = vadd.xlane.f32.xlu0 %v237_v36 }
 0x1da   :  { %242 = vadd.xlane.f32.xlu0 %v241_v38 }
 0x263   :  { %v239_v39 = vpop.xlane.xlu0 %238 }
 0x264   :  { %244 = vxpose.xlu1.b32.start [1/2] (short) (narrow) %v239_v39, 8 }
 0x267   :  { %v243_v40 = vpop.xlane.xlu0 %242 }
 0x268   :  { %245 = vxpose.xlu1.b32.end [2/2] (short) (narrow) %v243_v40, 8 }
 0x2e4   :  { %v260_v46 = vpop.trf.xlu1 }
 0x2e5   :  { %v286_v47 = vadd.f32 %v285_v45, %v260_v46 }
 0x2e7   :  { %288 = vst.msk [vmem:[#allocation3] sm:$0x1] %vm287_vm7, %v286_v47 }
 0x2e8   :  { %398 = shalt.err (!%p395_p4)
}
 0x2e9   :  { %s399_s9 = scalar_lea.hbm %s521_s7, 16 }
 0x2ea   :  { %p400_p5 = scmp.ne.s32.totalorder %s521_s7, %s399_s9  ;;  %p403_p6 = scmp.lt.u32.totalorder %s399_s9, %s521_s7 }
 0x2ec   :  { %p405_p7 = pnand %p403_p6, %p400_p5 }
 0x2ee   :  { %408 = shalt.err (!%p405_p7)
}
 0x2ef   :  { %298 = dma.vmem_to_hbm [thread:$0]  %s296_s5, 16, %s521_s7, [#allocation4]  }
 0x2f0   :  { %409 = dma.done.wait [#allocation4], 16  }
 0x2f1   :  { %410 = vsyncadd [#allocation4], 4294967280 }
 0x2f2   :  { %302 = vsyncpa [#allocation4], 1 }

</bundles_post_ra>
